<compile_context>
chip_gen: v7x
topology: tpu7x:2x2x1
jax: 0.10.0
libtpu: 0.0.40
codegen_flags: <defaults>
</compile_context>

<pallas_src>
import jax
import jax.numpy as jnp
from jax.experimental import pallas as pl
from jax.experimental.pallas import tpu as pltpu


# -----------------------------------------------------------------------------
# Fused sequence kernel: whole GRU recurrence in one pallas_call
# -----------------------------------------------------------------------------
def _gru_seq_kernel(tok_ref,     # SMEM (T,) int32    scalar-prefetched token ids
                    gi_tab_ref,  # VMEM (V, 1, 3H) f32  folded E@Wih^T + b_ih table
                    whh_ref,     # VMEM (H, 3H) bf16    recurrent weight (pre-transposed)
                    bhh_ref,     # VMEM (1, 3H) f32
                    h0_ref,      # VMEM (1, H) f32      initial hidden
                    hT_ref,      # VMEM (1, H) f32      output: final hidden
                    h_acc):      # VMEM scratch (1, H) f32  carried hidden state
    t = pl.program_id(0)

    @pl.when(t == 0)
    def _init():
        h_acc[...] = h0_ref[...].astype(jnp.float32)

    h = h_acc[...]                                   # (1, H) f32 carry

    # Input projection: pure gather from the VMEM-resident folded table
    # (already includes b_ih).  Dynamic index on the leading (untiled) dim.
    gi = gi_tab_ref[tok_ref[t]]                      # (1, 3H) f32

    # Recurrent projection on the MXU: bf16 inputs, f32 accumulation.
    gh = jnp.dot(h.astype(whh_ref.dtype), whh_ref[...],
                 preferred_element_type=jnp.float32) + bhh_ref[...]

    H = h.shape[-1]                                  # H is a multiple of 128,
    i_r, i_z, i_n = gi[:, 0:H], gi[:, H:2 * H], gi[:, 2 * H:3 * H]   # so gate
    h_r, h_z, h_n = gh[:, 0:H], gh[:, H:2 * H], gh[:, 2 * H:3 * H]   # slices are lane-aligned

    r = jax.nn.sigmoid(i_r + h_r)
    z = jax.nn.sigmoid(i_z + h_z)
    n = jnp.tanh(i_n + r * h_n)
    h_new = (1.0 - z) * n + z * h                    # f32 gate math / f32 carry

    h_acc[...] = h_new

    @pl.when(t == pl.num_programs(0) - 1)
    def _finalize():
        hT_ref[...] = h_new.astype(hT_ref.dtype)


@jax.jit
def encode_sequence(params, tokens, hidden):
    """Run the whole token sequence through the GRU in ONE pallas_call.

    Equivalent to:  h = hidden; for tok in tokens: h = EncoderRnn.forward(tok, h)
    tokens: (T,) int32, hidden: (1, 1, H) f32  ->  (1, 1, H) f32
    """
    gi_tab = params["gi_table"]           # (V, 1, 3H) f32
    whh_t = params["whh_t"]               # (H, 3H) bf16
    bhh = params["bhh"]                   # (1, 3H) f32
    V, _, G3 = gi_tab.shape
    H = hidden.shape[-1]
    T = tokens.shape[0]
    h0 = hidden.reshape(1, H).astype(jnp.float32)

    grid_spec = pltpu.PrefetchScalarGridSpec(
        num_scalar_prefetch=1,            # tokens -> SMEM, visible to kernel & index_maps
        grid=(T,),
        in_specs=[
            pl.BlockSpec((V, 1, G3), lambda t, tok: (0, 0, 0)),  # folded table, VMEM-resident
            pl.BlockSpec((H, G3), lambda t, tok: (0, 0)),        # W_hh^T, resident
            pl.BlockSpec((1, G3), lambda t, tok: (0, 0)),        # b_hh, resident
            pl.BlockSpec((1, H), lambda t, tok: (0, 0)),         # h0, resident
        ],
        out_specs=pl.BlockSpec((1, H), lambda t, tok: (0, 0)),   # final hidden (written at last step)
        scratch_shapes=[pltpu.VMEM((1, H), jnp.float32)],        # carried hidden state
    )

    h_final = pl.pallas_call(
        _gru_seq_kernel,
        grid_spec=grid_spec,
        out_shape=jax.ShapeDtypeStruct((1, H), jnp.float32),
        compiler_params=pltpu.CompilerParams(
            dimension_semantics=("arbitrary",)),                 # true recurrence: no pipelining across time
    )(tokens, gi_tab, whh_t, bhh, h0)

    return h_final.reshape(1, 1, H)


def encoder_forward(params, token, hidden):
    """PyTorch EncoderRnn.forward(inputs, hidden): one token step."""
    return encode_sequence(params, jnp.reshape(token, (1,)).astype(jnp.int32), hidden)


# -----------------------------------------------------------------------------
# Parameters: raw (PyTorch layout) + one-time preprocessing for the kernel
# -----------------------------------------------------------------------------
def init_encoder_params(key, input_size, hidden_size):
    """Raw parameters in PyTorch layout: W_* are (3H, H), b_* are (3H,)."""
    k_emb, k_wih, k_whh, k_bih, k_bhh = jax.random.split(key, 5)
    bound = 1.0 / jnp.sqrt(hidden_size)
    return {
        "embedding": jax.random.normal(k_emb, (input_size, hidden_size), jnp.float32),
        "w_ih": jax.random.uniform(k_wih, (3 * hidden_size, hidden_size), jnp.float32, -bound, bound),
        "w_hh": jax.random.uniform(k_whh, (3 * hidden_size, hidden_size), jnp.float32, -bound, bound),
        "b_ih": jax.random.uniform(k_bih, (3 * hidden_size,), jnp.float32, -bound, bound),
        "b_hh": jax.random.uniform(k_bhh, (3 * hidden_size,), jnp.float32, -bound, bound),
    }


def prepare_encoder_params(raw):
    """One-time parameter preprocessing (NOT per-forward work):
       - fold input projection into a (V, 1, 3H) table: E @ W_ih^T + b_ih
       - pre-transpose W_hh to (H, 3H) and cast to bf16 for the MXU
    """
    gi_table = jnp.dot(raw["embedding"], raw["w_ih"].T,
                       precision=jax.lax.Precision.HIGHEST) + raw["b_ih"][None, :]
    V, G3 = gi_table.shape
    return {
        "gi_table": gi_table.reshape(V, 1, G3).astype(jnp.float32),
        "whh_t": raw["w_hh"].T.astype(jnp.bfloat16),
        "bhh": raw["b_hh"].reshape(1, -1).astype(jnp.float32),
    }


# -----------------------------------------------------------------------------
# Pure-JAX reference (PyTorch nn.GRU semantics) for a correctness check
# -----------------------------------------------------------------------------
def encode_sequence_ref(params, tokens, hidden):
    H = hidden.shape[-1]
    h = hidden.reshape(1, H).astype(jnp.float32)
    for t in tokens:
        gi = params["gi_table"][t, 0, :][None, :]                      # same folded table
        gh = jnp.dot(h.astype(jnp.bfloat16), params["whh_t"],
                     preferred_element_type=jnp.float32) + params["bhh"]
        i_r, i_z, i_n = gi[:, :H], gi[:, H:2 * H], gi[:, 2 * H:]
        h_r, h_z, h_n = gh[:, :H], gh[:, H:2 * H], gh[:, 2 * H:]
        r = jax.nn.sigmoid(i_r + h_r)
        z = jax.nn.sigmoid(i_z + h_z)
        n = jnp.tanh(i_n + r * h_n)
        h = (1.0 - z) * n + z * h
    return h.reshape(1, 1, H)


def init_hidden(hidden_size):
    return jnp.zeros((1, 1, hidden_size), jnp.float32)   # EncoderRnn.initHidden()


if __name__ == "__main__":
    input_size = 32      # small vocab
    hidden_size = 256    # matches the spec's hidden_size (lane-aligned)
    seq_len = 8

    key = jax.random.PRNGKey(0)
    raw = init_encoder_params(key, input_size, hidden_size)
    params = prepare_encoder_params(raw)

    tokens = jax.random.randint(jax.random.PRNGKey(1), (seq_len,), 0, input_size, jnp.int32)
    h0 = init_hidden(hidden_size)

    # Equivalent of EncoderRnn.sample(tokens): whole sequence, ONE kernel launch.
    h = encode_sequence(params, tokens, h0)
    h = jax.block_until_ready(h)

    h_ref = encode_sequence_ref(params, tokens, h0)
    assert h.shape == (1, 1, hidden_size)
    assert jnp.all(jnp.isfinite(h))
    max_err = float(jnp.max(jnp.abs(h - h_ref)))
    assert max_err < 1e-2, f"mismatch vs reference: {max_err}"

    # TODO(synk): batching independent sequences (B rows of h) would be needed to
    # approach MXU roofline; the module's forward is strictly batch=1, so it is
    # kept single-sequence here.
    print("KERNEL_OK")
</pallas_src>

<mosaic_0001>
module attributes {stable_mosaic.version = 11 : i64} {
  func.func @_gru_seq_kernel(%arg0: i32, %arg1: memref<8xi32, #tpu.memory_space<smem>>, %arg2: memref<32x1x768xf32, #tpu.memory_space<vmem>>, %arg3: memref<256x768xbf16, #tpu.memory_space<vmem>>, %arg4: memref<1x768xf32, #tpu.memory_space<vmem>>, %arg5: memref<1x256xf32, #tpu.memory_space<vmem>>, %arg6: memref<1x256xf32, #tpu.memory_space<vmem>>, %arg7: memref<1x256xf32, #tpu.memory_space<vmem>>) attributes {dimension_semantics = [#tpu.dimension_semantics<arbitrary>], iteration_bounds = array<i64: 8>, scalar_prefetch = 1 : i64, scratch_operands = 1 : i64, tpu.core_type = #tpu.core_type<tc>, window_params = [{pipeline_mode = #tpu.pipeline_mode<synchronous>, transform_indices = @transform_0, window_bounds = array<i64: 32, 1, 768>}, {pipeline_mode = #tpu.pipeline_mode<synchronous>, transform_indices = @transform_1, window_bounds = array<i64: 256, 768>}, {pipeline_mode = #tpu.pipeline_mode<synchronous>, transform_indices = @transform_2, window_bounds = array<i64: 1, 768>}, {pipeline_mode = #tpu.pipeline_mode<synchronous>, transform_indices = @transform_3, window_bounds = array<i64: 1, 256>}, {pipeline_mode = #tpu.pipeline_mode<synchronous>, transform_indices = @transform_4, window_bounds = array<i64: 1, 256>}]} {
    %c0_i32 = arith.constant 0 : i32
    %0 = arith.cmpi eq, %arg0, %c0_i32 : i32
    %1 = arith.extui %0 : i1 to i32
    %c0_i32_0 = arith.constant 0 : i32
    %2 = arith.cmpi ne, %1, %c0_i32_0 : i32
    scf.if %2 {
      %c0_14 = arith.constant 0 : index
      %c0_15 = arith.constant 0 : index
      %44 = vector.load %arg5[%c0_14, %c0_15] : memref<1x256xf32, #tpu.memory_space<vmem>>, vector<1x256xf32>
      %c0_16 = arith.constant 0 : index
      %c0_17 = arith.constant 0 : index
      %45 = vector.load %arg7[%c0_16, %c0_17] : memref<1x256xf32, #tpu.memory_space<vmem>>, vector<1x256xf32>
      tpu.vector_store %arg7[%c0_16, %c0_17], %44 {strides = array<i32>} : memref<1x256xf32, #tpu.memory_space<vmem>>, vector<1x256xf32>,
    } else {
    }
    %c0 = arith.constant 0 : index
    %c0_1 = arith.constant 0 : index
    %3 = vector.load %arg7[%c0, %c0_1] : memref<1x256xf32, #tpu.memory_space<vmem>>, vector<1x256xf32>
    %4 = arith.index_cast %arg0 : i32 to index
    %5 = memref.load %arg1[%4] : memref<8xi32, #tpu.memory_space<smem>>
    %6 = arith.index_cast %5 : i32 to index
    %c0_2 = arith.constant 0 : index
    %c0_3 = arith.constant 0 : index
    %7 = vector.load %arg2[%6, %c0_2, %c0_3] : memref<32x1x768xf32, #tpu.memory_space<vmem>>, vector<1x1x768xf32>
    %8 = vector.shape_cast %7 : vector<1x1x768xf32> to vector<1x768xf32>
    %9 = arith.truncf %3 : vector<1x256xf32> to vector<1x256xbf16>
    %c0_4 = arith.constant 0 : index
    %c0_5 = arith.constant 0 : index
    %10 = vector.load %arg3[%c0_4, %c0_5] : memref<256x768xbf16, #tpu.memory_space<vmem>>, vector<256x768xbf16>
    %cst = arith.constant dense<0.000000e+00> : vector<1x768xf32>
    %11 = tpu.matmul %9, %10, %cst {dimension_numbers = #tpu.dot_dimension_numbers<[1], [0], [0], [1], [0, 0, 1, 1], [], []>} : vector<1x256xbf16>, vector<256x768xbf16>, vector<1x768xf32> -> vector<1x768xf32>
    %c0_6 = arith.constant 0 : index
    %c0_7 = arith.constant 0 : index
    %12 = vector.load %arg4[%c0_6, %c0_7] : memref<1x768xf32, #tpu.memory_space<vmem>>, vector<1x768xf32>
    %13 = arith.addf %11, %12 : vector<1x768xf32>
    %14 = vector.extract_strided_slice %8 {offsets = [0, 0], sizes = [1, 256], strides = [1, 1]} : vector<1x768xf32> to vector<1x256xf32>
    %15 = vector.extract_strided_slice %8 {offsets = [0, 256], sizes = [1, 256], strides = [1, 1]} : vector<1x768xf32> to vector<1x256xf32>
    %16 = vector.extract_strided_slice %8 {offsets = [0, 512], sizes = [1, 256], strides = [1, 1]} : vector<1x768xf32> to vector<1x256xf32>
    %17 = vector.extract_strided_slice %13 {offsets = [0, 0], sizes = [1, 256], strides = [1, 1]} : vector<1x768xf32> to vector<1x256xf32>
    %18 = vector.extract_strided_slice %13 {offsets = [0, 256], sizes = [1, 256], strides = [1, 1]} : vector<1x768xf32> to vector<1x256xf32>
    %19 = vector.extract_strided_slice %13 {offsets = [0, 512], sizes = [1, 256], strides = [1, 1]} : vector<1x768xf32> to vector<1x256xf32>
    %20 = arith.addf %14, %17 : vector<1x256xf32>
    %21 = arith.negf %20 : vector<1x256xf32>
    %22 = math.exp %21 : vector<1x256xf32>
    %cst_8 = arith.constant 1.000000e+00 : f32
    %23 = vector.broadcast %cst_8 : f32 to vector<1x256xf32>
    %24 = arith.addf %23, %22 : vector<1x256xf32>
    %25 = arith.divf %23, %24 : vector<1x256xf32>
    %26 = arith.addf %15, %18 : vector<1x256xf32>
    %27 = arith.negf %26 : vector<1x256xf32>
    %28 = math.exp %27 : vector<1x256xf32>
    %cst_9 = arith.constant 1.000000e+00 : f32
    %29 = vector.broadcast %cst_9 : f32 to vector<1x256xf32>
    %30 = arith.addf %29, %28 : vector<1x256xf32>
    %31 = arith.divf %29, %30 : vector<1x256xf32>
    %32 = arith.mulf %25, %19 : vector<1x256xf32>
    %33 = arith.addf %16, %32 : vector<1x256xf32>
    %34 = math.tanh %33 : vector<1x256xf32>
    %cst_10 = arith.constant 1.000000e+00 : f32
    %35 = vector.broadcast %cst_10 : f32 to vector<1x256xf32>
    %36 = arith.subf %35, %31 : vector<1x256xf32>
    %37 = arith.mulf %36, %34 : vector<1x256xf32>
    %38 = arith.mulf %31, %3 : vector<1x256xf32>
    %39 = arith.addf %37, %38 : vector<1x256xf32>
    %c0_11 = arith.constant 0 : index
    %c0_12 = arith.constant 0 : index
    %40 = vector.load %arg7[%c0_11, %c0_12] : memref<1x256xf32, #tpu.memory_space<vmem>>, vector<1x256xf32>
    tpu.vector_store %arg7[%c0_11, %c0_12], %39 {strides = array<i32>} : memref<1x256xf32, #tpu.memory_space<vmem>>, vector<1x256xf32>,
    %c7_i32 = arith.constant 7 : i32
    %41 = arith.cmpi eq, %arg0, %c7_i32 : i32
    %42 = arith.extui %41 : i1 to i32
    %c0_i32_13 = arith.constant 0 : i32
    %43 = arith.cmpi ne, %42, %c0_i32_13 : i32
    scf.if %43 {
      %c0_14 = arith.constant 0 : index
      %c0_15 = arith.constant 0 : index
      %44 = vector.load %arg6[%c0_14, %c0_15] : memref<1x256xf32, #tpu.memory_space<vmem>>, vector<1x256xf32>
      tpu.vector_store %arg6[%c0_14, %c0_15], %39 {strides = array<i32>} : memref<1x256xf32, #tpu.memory_space<vmem>>, vector<1x256xf32>,
    } else {
    }
    return
  }
  func.func @transform_0(%arg0: i32, %arg1: memref<8xi32, #tpu.memory_space<smem>>) -> (i32, i32, i32) {
    %c0_i32 = arith.constant 0 : i32
    %c0_i32_0 = arith.constant 0 : i32
    %c0_i32_1 = arith.constant 0 : i32
    %c0_i32_2 = arith.constant 0 : i32
    return %c0_i32, %c0_i32_0, %c0_i32_1 : i32, i32, i32
  }
  func.func @transform_1(%arg0: i32, %arg1: memref<8xi32, #tpu.memory_space<smem>>) -> (i32, i32) {
    %c0_i32 = arith.constant 0 : i32
    %c0_i32_0 = arith.constant 0 : i32
    %c0_i32_1 = arith.constant 0 : i32
    return %c0_i32, %c0_i32_0 : i32, i32
  }
  func.func @transform_2(%arg0: i32, %arg1: memref<8xi32, #tpu.memory_space<smem>>) -> (i32, i32) {
    %c0_i32 = arith.constant 0 : i32
    %c0_i32_0 = arith.constant 0 : i32
    %c0_i32_1 = arith.constant 0 : i32
    return %c0_i32, %c0_i32_0 : i32, i32
  }
  func.func @transform_3(%arg0: i32, %arg1: memref<8xi32, #tpu.memory_space<smem>>) -> (i32, i32) {
    %c0_i32 = arith.constant 0 : i32
    %c0_i32_0 = arith.constant 0 : i32
    %c0_i32_1 = arith.constant 0 : i32
    return %c0_i32, %c0_i32_0 : i32, i32
  }
  func.func @transform_4(%arg0: i32, %arg1: memref<8xi32, #tpu.memory_space<smem>>) -> (i32, i32) {
    %c0_i32 = arith.constant 0 : i32
    %c0_i32_0 = arith.constant 0 : i32
    %c0_i32_1 = arith.constant 0 : i32
    return %c0_i32, %c0_i32_0 : i32, i32
  }
}

</mosaic_0001>

<bundles_post_ra>
// kernel: encode_sequence.1
= control target key start
LH: loop header
LB: loop body
LE: loop exit
PB: predicated region body
PF: predicated region fallthrough
CT: control target
= control target key end

     0   :  { %s1813_s0 = inlined_call_operand.vmem [shape: s32[8], index: 0, kind: input, shape index: {}]   ;;  %s1814_s1 = inlined_call_operand.hbm [shape: f32[32,1,768], index: 1, kind: input, shape index: {}]   ;;  %s1815_s2 = inlined_call_operand.hbm [shape: bf16[256,768], index: 2, kind: input, shape index: {}]   ;;  %s1816_s3 = inlined_call_operand.hbm [shape: f32[1,768], index: 3, kind: input, shape index: {}]   ;;  %s1817_s4 = inlined_call_operand.vmem [shape: f32[1,256], index: 4, kind: input, shape index: {}]   ;;  %s1818_s5 = inlined_call_operand.hbm [shape: f32[1,256], index: 5, kind: output, shape index: {}]  }
   0x1   :  { %s10_s20 = sshll.u32 %s1813_s0, 4  ;;  %s11_s20 = int_to_ptr.vmem [resolvable:$true] %s10_s20 }
   0x2   :  { %s1448_s21 = scalar_lea.vmem %s11_s20, 16  ;;  %p1453_p1 = scmp.lt.s32.totalorder %s11_s20, %s11_s20 }
   0x3   :  { %p1449_p0 = scmp.ne.s32.totalorder %s11_s20, %s1448_s21  ;;  %p1454_p2 = scmp.lt.s32.totalorder %s1448_s21, %s1448_s21 }
   0x5   :  { %p1455_p3 = por %p1454_p2, %p1453_p1 }
   0x7   :  { %p1456_p4 = pnand %p1455_p3, %p1449_p0 }
   0x9   :  { %1459 = shalt.err (!%p1456_p4)  }
   0xa   :  { %s1592_s22 = smov [#allocation4]  }
   0xb   :  { %13 = dma.vmem_to_smem %s11_s20, 16, %s1592_s22, [#allocation3] }
   0xc   :  { %1574 = dma.done.wait [#allocation3], 16 }
   0xd   :  { %1575 = vsyncadd [#allocation3], 4294967280 }
   0xe   :  { %15 = sfence }
   0xf   :  { %16 = vsyncpa [#allocation6], 0 }
  0x10   :  { %17 = vsyncpa [#allocation9], 0 }
  0x11   :  { %18 = vsyncpa [#allocation7], 0  ;;  %s1635_s23 = smov 0  }
  0x12 LB: > { %s1593_s0 = smov [#allocation8]   ;;  %s1641_s25 = sadd.s32 4294967295, %s1590_s23   ;;  %s1590_s23 = sphi %s1635_s23, %s24_s23  }
  0x13   : > { %s159_s24 = sshll.u32 %s1593_s0, 4  ;;  %p1130_p5 = scmp.ge.s32.totalorder %s1590_s23, 1  ;;  %s1651_s24 = int_to_ptr.vmem [resolvable:$true] %s159_s24 }
  0x14   : > { %p134_p6 = scmp.lt.s32.totalorder %s1590_s23, 9  ;;  %p1819_p8 = scmp.eq.s32.totalorder %s1641_s25, 0 }
  0x15   : > { %s1594_s27 = smov [#allocation5]   ;;  %s1595_s30 = smov [#allocation10]  }
  0x16   : > { %p1647_p9 = pnand %p1130_p5, %p134_p6  ;;  %s146_s28 = sshll.u32 %s1594_s27, 4  ;;  %s1655_s28 = int_to_ptr.vmem [resolvable:$true] %s146_s28 }
  0x17   : > { %s1663_s6 = sshll.u32 %s1595_s30, 4  ;;  %s1460_s9 = scalar_lea.hbm %s1815_s2, 12288  ;;  %s174_s6 = int_to_ptr.vmem [resolvable:$true] %s1663_s6 }
  0x18   : > { %s1821_s26 = scalar_select %p1647_p9, 1, 0 }
  0x19   : > { %p1258_p10 = pneg %p1647_p9  ;;  %p1461_p12 = scmp.ne.s32.totalorder %s1815_s2, %s1460_s9 }
  0x1a   : > { %p1467_p2 = scmp.lt.u32.totalorder %s1460_s9, %s1815_s2 }
  0x1b   : > { %p1659_p11 = pnand %p1819_p8, %p1258_p10 }
  0x1d   : > { %p1673_p13 = pneg %p1659_p11 }
  0x1f   : > { %p1463_p0 = pnand %p1673_p13, %p1461_p12 }
  0x21   : > { %p1464_p1 = pneg %p1463_p0 }
  0x23   : > { %p1469_p3 = pnand %p1467_p2, %p1464_p1 }
  0x25   : > { %1472 = shalt.err (!%p1469_p3)
}
  0x26   : > { %s1473_s15 = scalar_lea.vmem %s1651_s24, 12288  ;;  %p1481_p10 = scmp.lt.s32.totalorder %s1651_s24, %s1651_s24 }
  0x27   : > { %p1474_p4 = scmp.ne.s32.totalorder %s1651_s24, %s1473_s15  ;;  %p1482_p7 = scmp.lt.s32.totalorder %s1473_s15, %s1473_s15 }
  0x29   : > { %p1476_p5 = pnand %p1474_p4, %p1673_p13  ;;  %p1483_p12 = por %p1482_p7, %p1481_p10 }
  0x2b   : > { %p1477_p6 = pneg %p1476_p5 }
  0x2d   : > { %p1484_p0 = pnand %p1483_p12, %p1477_p6 }
  0x2f   : > { %1487 = shalt.err (!%p1484_p0)
}
  0x30   : > { %s1596_s16 = smov 384   ;;  %s1597_s17 = smov 24  }
  0x31   : > { %1264 = dma.hbm_to_vmem [thread:$0]  (!%p1659_p11), %s1815_s2, 12288, %s1651_s24, [#allocation9], %s1596_s16, %s1596_s16, %s1597_s17  }
  0x32   : > { %s1488_s22 = scalar_lea.hbm %s1814_s1, 3072 }
  0x33   : > { %p1489_p7 = scmp.ne.s32.totalorder %s1814_s1, %s1488_s22  ;;  %p1495_p3 = scmp.lt.u32.totalorder %s1488_s22, %s1814_s1 }
  0x35   : > { %p1491_p1 = pnand %p1489_p7, %p1673_p13 }
  0x37   : > { %p1492_p2 = pneg %p1491_p1 }
  0x39   : > { %p1497_p4 = pnand %p1495_p3, %p1492_p2 }
  0x3b   : > { %1500 = shalt.err (!%p1497_p4)
}
  0x3c   : > { %s1501_s24 = scalar_lea.vmem %s1655_s28, 3072  ;;  %p1509_p12 = scmp.lt.s32.totalorder %s1655_s28, %s1655_s28 }
  0x3d   : > { %p1502_p5 = scmp.ne.s32.totalorder %s1655_s28, %s1501_s24  ;;  %p1510_p0 = scmp.lt.s32.totalorder %s1501_s24, %s1501_s24 }
  0x3f   : > { %p1504_p6 = pnand %p1502_p5, %p1673_p13  ;;  %p1511_p7 = por %p1510_p0, %p1509_p12 }
  0x41   : > { %p1505_p10 = pneg %p1504_p6 }
  0x43   : > { %p1512_p1 = pnand %p1511_p7, %p1505_p10 }
  0x45   : > { %1515 = shalt.err (!%p1512_p1)
}
  0x46   : > { %s1598_s8 = smov 96   ;;  %s1599_s9 = smov 6  }
  0x47   : > { %1261 = dma.hbm_to_vmem [thread:$0]  (!%p1659_p11), %s1814_s1, 3072, %s1655_s28, [#allocation6], %s1598_s8, %s1598_s8, %s1599_s9  }
  0x48   : > { %s1516_s15 = scalar_lea.hbm %s1816_s3, 96 }
  0x49   : > { %p1517_p2 = scmp.ne.s32.totalorder %s1816_s3, %s1516_s15  ;;  %p1523_p5 = scmp.lt.u32.totalorder %s1516_s15, %s1816_s3 }
  0x4b   : > { %p1519_p3 = pnand %p1517_p2, %p1673_p13 }
  0x4d   : > { %p1520_p4 = pneg %p1519_p3 }
  0x4f   : > { %p1525_p6 = pnand %p1523_p5, %p1520_p4 }
  0x51   : > { %1528 = shalt.err (!%p1525_p6)
}
  0x52   : > { %s1529_s20 = scalar_lea.vmem %s174_s6, 96  ;;  %p1537_p7 = scmp.lt.s32.totalorder %s174_s6, %s174_s6 }
  0x53   : > { %p1530_p10 = scmp.ne.s32.totalorder %s174_s6, %s1529_s20  ;;  %p1538_p1 = scmp.lt.s32.totalorder %s1529_s20, %s1529_s20 }
  0x55   : > { %p1532_p12 = pnand %p1530_p10, %p1673_p13  ;;  %p1539_p8 = por %p1538_p1, %p1537_p7 }
  0x57   : > { %p1533_p0 = pneg %p1532_p12 }
  0x59   : > { %p1540_p9 = pnand %p1539_p8, %p1533_p0 }
  0x5b   : > { %1543 = shalt.err (!%p1540_p9)
}
  0x5c   : > { %1267 = dma.hbm_to_vmem [thread:$0]  (!%p1659_p11), %s1816_s3, 96, %s174_s6, [#allocation9]  }
  0x5d   : > { %p1824_p2 = scmp.ne.s32.totalorder %s1821_s26, 0 }
  0x5e   : > { %p1825_p3 = scmp.eq.s32.totalorder (!%p1824_p2), %s1641_s25, 0 }
  0x5f   : > { %189 = sbr.rel (%p1824_p2) target bundleno = 510 (0x1fe), region = 36 }
  0x66   : > { %1577 = dma.done.wait (%p1825_p3), [#allocation6], 3072   ;;  %p1826_p13 = pmov %p1825_p3 }
  0x67   : > { %p1827_p4 = pmov %p1825_p3 }
  0x68   : > { %1579 = vsyncadd (%p1826_p13), [#allocation6], 4294964224 }
  0x69   : > { %1581 = dma.done.wait (%p1827_p4), [#allocation9], 12384   ;;  %p1828_p8 = pmov %p1825_p3 }
  0x6a   : > { %p1829_p9 = scmp.ne.s32.totalorder %s1641_s25, 0 }
  0x6b   : > { %1583 = vsyncadd (%p1828_p8), [#allocation9], 4294954912  ;;  %v217_v0 = vld [vmem:[%s1817_s4] sm:$0x3] (!%p1829_p9)  ;;  %v218_v1 = vlaneseq (!%p1829_p9) }
  0x6c   : > { %216 = sbr.rel (%p1829_p9) target bundleno = 115 (0x73), region = 52 }
  0x6d   : > { %vm220_vm0 = vcmp.lt.s32.totalorder (!%p1829_p9), %v218_v1, 256 }
  0x6e   : > { %222 = vst.msk [vmem:[#allocation2] sm:$0x3] (!%p1829_p9), %vm220_vm0, %v217_v0 }
  0x73 PF: > { %v1294_v2 = vld [vmem:[#allocation8 + $0x4] ss:$24 sps:$4 sm:$0xff]   ;;  %v1296_v3 = vld [vmem:[#allocation8] ss:$24 sps:$4 sm:$0xff]   ;;  %v1297_v4 = vld [vmem:[#allocation8 + $0x34] ss:$24 sps:$4 sm:$0xff]   ;;  %v229_v14 = vlaneseq }
  0x74   : > { %849 = vmatprep.subr.bf16.mxu0 %v1294_v2  ;;  %v1299_v5 = vld [vmem:[#allocation8 + $0x30] ss:$24 sps:$4 sm:$0xff]   ;;  %v1300_v6 = vld [vmem:[#allocation8 + $0x64] ss:$24 sps:$4 sm:$0xff]   ;;  %v1302_v7 = vld [vmem:[#allocation8 + $0x60] ss:$24 sps:$4 sm:$0xff]  }
  0x75   : > { %850 = vmatpush1.bf16.msra.mxu0 %v1296_v3  ;;  %v1303_v8 = vld [vmem:[#allocation8 + $0x94] ss:$24 sps:$4 sm:$0xff]   ;;  %v1305_v9 = vld [vmem:[#allocation8 + $0x90] ss:$24 sps:$4 sm:$0xff]   ;;  %v1306_v10 = vld [vmem:[#allocation8 + $0xc4] ss:$24 sps:$4 sm:$0xff]  }
  0x76   : > { %851 = vmatprep.subr.bf16.mxu0 %v1297_v4  ;;  %v1308_v11 = vld [vmem:[#allocation8 + $0xc0] ss:$24 sps:$4 sm:$0xff]   ;;  %v1309_v12 = vld [vmem:[#allocation8 + $0xf4] ss:$24 sps:$4 sm:$0xff]   ;;  %v1311_v16 = vld [vmem:[#allocation8 + $0xf0] ss:$24 sps:$4 sm:$0xff]  }
  0x77   : > { %v1330_v13 = vld [vmem:[#allocation8 + $0xc] ss:$24 sps:$4 sm:$0xff]   ;;  %v1332_v15 = vld [vmem:[#allocation8 + $0x8] ss:$24 sps:$4 sm:$0xff]   ;;  %v1336_v17 = vld [vmem:[#allocation8 + $0x3c] ss:$24 sps:$4 sm:$0xff]  }
  0x78   : > { %890 = vmatprep.subr.bf16.mxu1 %v1330_v13  ;;  %v1338_v18 = vld [vmem:[#allocation8 + $0x38] ss:$24 sps:$4 sm:$0xff]   ;;  %v1312_v19 = vld [vmem:[#allocation8 + $0x124] ss:$24 sps:$4 sm:$0xff]   ;;  %v1752_v20 = vshrl.u32 %v229_v14, 7  ;;  %s224_s26 = sld [smem:[#allocation4 + %s1641_s25]] }
  0x79   : > { %852 = vmatpush1.bf16.msra.mxu0 %v1299_v5  ;;  %891 = vmatpush1.bf16.msra.mxu1 %v1332_v15  ;;  %v1314_v21 = vld [vmem:[#allocation8 + $0x120] ss:$24 sps:$4 sm:$0xff]   ;;  %v1342_v22 = vld [vmem:[#allocation8 + $0x6c] ss:$24 sps:$4 sm:$0xff]   ;;  %v1348_v25 = vld [vmem:[#allocation8 + $0x9c] ss:$24 sps:$4 sm:$0xff]  }
  0x7a   : > { %853 = vmatprep.subr.bf16.mxu0 %v1300_v6  ;;  %892 = vmatprep.subr.bf16.mxu1 %v1336_v17  ;;  %v1315_v23 = vld [vmem:[#allocation8 + $0x154] ss:$24 sps:$4 sm:$0xff]   ;;  %v1344_v24 = vld [vmem:[#allocation8 + $0x68] ss:$24 sps:$4 sm:$0xff]   ;;  %v235_v26 = vsub.s32 1, %v1752_v20  ;;  %v231_v60 = vsub.s32 0, %v1752_v20 }
  0x7b   : > { %v1317_v27 = vld [vmem:[#allocation8 + $0x150] ss:$24 sps:$4 sm:$0xff]   ;;  %v1318_v28 = vld [vmem:[#allocation8 + $0x184] ss:$24 sps:$4 sm:$0xff]   ;;  %v1320_v33 = vld [vmem:[#allocation8 + $0x180] ss:$24 sps:$4 sm:$0xff]  }
  0x7c   : > { %v1350_v29 = vld [vmem:[#allocation8 + $0x98] ss:$24 sps:$4 sm:$0xff]   ;;  %v1755_v30 = vld [vmem:[#allocation2] sm:$0x3]  ;;  %v1354_v31 = vld [vmem:[#allocation8 + $0xcc] ss:$24 sps:$4 sm:$0xff]  }
  0x7d   : > { %854 = vmatpush1.bf16.msra.mxu0 %v1302_v7  ;;  %893 = vmatpush1.bf16.msra.mxu1 %v1338_v18  ;;  %v236_v32 = vrot.slane %v1755_v30, %v235_v26  ;;  %v1321_v34 = vld [vmem:[#allocation8 + $0x1b4] ss:$24 sps:$4 sm:$0xff]   ;;  %v1356_v36 = vld [vmem:[#allocation8 + $0xc8] ss:$24 sps:$4 sm:$0xff]   ;;  %v1324_v39 = vld [vmem:[#allocation8 + $0x1e4] ss:$24 sps:$4 sm:$0xff]   ;;  %v232_v0 = vrot.slane %v1755_v30, %v231_v60 }
  0x7e   : > { %855 = vmatprep.subr.bf16.mxu0 %v1303_v8  ;;  %894 = vmatprep.subr.bf16.mxu1 %v1342_v22  ;;  %v1360_v37 = vld [vmem:[#allocation8 + $0xfc] ss:$24 sps:$4 sm:$0xff]   ;;  %v1323_v38 = vld [vmem:[#allocation8 + $0x1b0] ss:$24 sps:$4 sm:$0xff]   ;;  %v1366_v41 = vld [vmem:[#allocation8 + $0x12c] ss:$24 sps:$4 sm:$0xff]  }
  0x7f   : > { %v1760_v35 = vpack.c.bf16 %v236_v32, %v236_v32  ;;  %v1362_v40 = vld [vmem:[#allocation8 + $0xf8] ss:$24 sps:$4 sm:$0xff]   ;;  %v1327_v43 = vld [vmem:[#allocation8 + $0x214] ss:$24 sps:$4 sm:$0xff]   ;;  %v1368_v44 = vld [vmem:[#allocation8 + $0x128] ss:$24 sps:$4 sm:$0xff]   ;;  %v1768_v4 = vpack.c.bf16 %v232_v0, %v232_v0 }
  0x80   : > { %v1326_v42 = vld [vmem:[#allocation8 + $0x1e0] ss:$24 sps:$4 sm:$0xff]   ;;  %v1372_v45 = vld [vmem:[#allocation8 + $0x15c] ss:$24 sps:$4 sm:$0xff]   ;;  %v1329_v46 = vld [vmem:[#allocation8 + $0x210] ss:$24 sps:$4 sm:$0xff]  }
  0x81   : > { %856 = vmatpush1.bf16.msra.mxu0 %v1305_v9  ;;  %895 = vmatpush1.bf16.msra.mxu1 %v1344_v24  ;;  %v1333_v47 = vld [vmem:[#allocation8 + $0x244] ss:$24 sps:$4 sm:$0xff]   ;;  %v1374_v48 = vld [vmem:[#allocation8 + $0x158] ss:$24 sps:$4 sm:$0xff]   ;;  %v1339_v51 = vld [vmem:[#allocation8 + $0x274] ss:$24 sps:$4 sm:$0xff]  }
  0x82   : > { %857 = vmatprep.subr.bf16.mxu0 %v1306_v10  ;;  %896 = vmatprep.subr.bf16.mxu1 %v1348_v25  ;;  %v1378_v49 = vld [vmem:[#allocation8 + $0x18c] ss:$24 sps:$4 sm:$0xff]   ;;  %v1335_v50 = vld [vmem:[#allocation8 + $0x240] ss:$24 sps:$4 sm:$0xff]   ;;  %v1384_v53 = vld [vmem:[#allocation8 + $0x1bc] ss:$24 sps:$4 sm:$0xff]  }
  0x83   : > { %881 = vmatprep.mubr.bf16.mxu0 %v1760_v35  ;;  %922 = vmatprep.mubr.bf16.mxu1 %v1760_v35  ;;  %v1380_v52 = vld [vmem:[#allocation8 + $0x188] ss:$24 sps:$4 sm:$0xff]   ;;  %v1345_v55 = vld [vmem:[#allocation8 + $0x2a4] ss:$24 sps:$4 sm:$0xff]   ;;  %v1386_v56 = vld [vmem:[#allocation8 + $0x1b8] ss:$24 sps:$4 sm:$0xff]  }
  0x84   : > { %v1341_v54 = vld [vmem:[#allocation8 + $0x270] ss:$24 sps:$4 sm:$0xff]   ;;  %v1390_v57 = vld [vmem:[#allocation8 + $0x1ec] ss:$24 sps:$4 sm:$0xff]   ;;  %v1347_v58 = vld [vmem:[#allocation8 + $0x2a0] ss:$24 sps:$4 sm:$0xff]  }
  0x85   : > { %858 = vmatpush1.bf16.msra.mxu0 %v1308_v11  ;;  %897 = vmatpush1.bf16.msra.mxu1 %v1350_v29  ;;  %v1351_v59 = vld [vmem:[#allocation8 + $0x2d4] ss:$24 sps:$4 sm:$0xff]   ;;  %v1392_v61 = vld [vmem:[#allocation8 + $0x1e8] ss:$24 sps:$4 sm:$0xff]   ;;  %v1398_v2 = vld [vmem:[#allocation8 + $0x218] ss:$24 sps:$4 sm:$0xff]  }
  0x86   : > { %859 = vmatprep.subr.bf16.mxu0 %v1309_v12  ;;  %898 = vmatprep.subr.bf16.mxu1 %v1354_v31  ;;  %v1396_v62 = vld [vmem:[#allocation8 + $0x21c] ss:$24 sps:$4 sm:$0xff]   ;;  %v1353_v63 = vld [vmem:[#allocation8 + $0x2d0] ss:$24 sps:$4 sm:$0xff]   ;;  %v1402_v3 = vld [vmem:[#allocation8 + $0x24c] ss:$24 sps:$4 sm:$0xff]  }
  0x87   : > { %v1359_v1 = vld [vmem:[#allocation8 + $0x14] ss:$24 sps:$4 sm:$0xff]   ;;  %v1357_v5 = vld [vmem:[#allocation8 + $0x10] ss:$24 sps:$4 sm:$0xff]   ;;  %v1365_v7 = vld [vmem:[#allocation8 + $0x44] ss:$24 sps:$4 sm:$0xff]  }
  0x88   : > { %v1404_v6 = vld [vmem:[#allocation8 + $0x248] ss:$24 sps:$4 sm:$0xff]   ;;  %v1408_v8 = vld [vmem:[#allocation8 + $0x27c] ss:$24 sps:$4 sm:$0xff]   ;;  %v1410_v10 = vld [vmem:[#allocation8 + $0x278] ss:$24 sps:$4 sm:$0xff]  }
  0x89   : > { %860 = vmatpush1.bf16.msra.mxu0 %v1311_v16  ;;  %899 = vmatpush1.bf16.msra.mxu1 %v1356_v36  ;;  %v1363_v9 = vld [vmem:[#allocation8 + $0x40] ss:$24 sps:$4 sm:$0xff]   ;;  %v1371_v11 = vld [vmem:[#allocation8 + $0x74] ss:$24 sps:$4 sm:$0xff]   ;;  %v1369_v13 = vld [vmem:[#allocation8 + $0x70] ss:$24 sps:$4 sm:$0xff]  }
  0x8a   : > { %861 = vmatprep.subr.bf16.mxu0 %v1312_v19  ;;  %900 = vmatprep.subr.bf16.mxu1 %v1360_v37  ;;  %v1414_v12 = vld [vmem:[#allocation8 + $0x2ac] ss:$24 sps:$4 sm:$0xff]   ;;  %v1416_v15 = vld [vmem:[#allocation8 + $0x2a8] ss:$24 sps:$4 sm:$0xff]   ;;  %v1420_v17 = vld [vmem:[#allocation8 + $0x2dc] ss:$24 sps:$4 sm:$0xff]  }
  0x8b   : > { %v1377_v16 = vld [vmem:[#allocation8 + $0xa4] ss:$24 sps:$4 sm:$0xff]   ;;  %v1375_v18 = vld [vmem:[#allocation8 + $0xa0] ss:$24 sps:$4 sm:$0xff]   ;;  %v1381_v22 = vld [vmem:[#allocation8 + $0xd0] ss:$24 sps:$4 sm:$0xff]  }
  0x8c   : > { %v1422_v19 = vld [vmem:[#allocation8 + $0x2d8] ss:$24 sps:$4 sm:$0xff]   ;;  %v1395_v25 = vld [vmem:[#allocation8 + $0x134] ss:$24 sps:$4 sm:$0xff]   ;;  %v1425_v37 = vld [vmem:[#allocation8 + $0x224] ss:$24 sps:$4 sm:$0xff]  }
  0x8d   : > { %862 = vmatpush1.bf16.msra.mxu0 %v1314_v21  ;;  %901 = vmatpush1.bf16.msra.mxu1 %v1362_v40  ;;  %v1383_v21 = vld [vmem:[#allocation8 + $0xd4] ss:$24 sps:$4 sm:$0xff]   ;;  %v1387_v24 = vld [vmem:[#allocation8 + $0x100] ss:$24 sps:$4 sm:$0xff]   ;;  %v1405_v32 = vld [vmem:[#allocation8 + $0x190] ss:$24 sps:$4 sm:$0xff]  }
  0x8e   : > { %863 = vmatprep.subr.bf16.mxu0 %v1315_v23  ;;  %902 = vmatprep.subr.bf16.mxu1 %v1366_v41  ;;  %v1389_v23 = vld [vmem:[#allocation8 + $0x104] ss:$24 sps:$4 sm:$0xff]   ;;  %v1399_v29 = vld [vmem:[#allocation8 + $0x160] ss:$24 sps:$4 sm:$0xff]   ;;  %v1407_v31 = vld [vmem:[#allocation8 + $0x194] ss:$24 sps:$4 sm:$0xff]  }
  0x8f   : > { %v1417_v36 = vld [vmem:[#allocation8 + $0x1f0] ss:$24 sps:$4 sm:$0xff]   ;;  %v1431_v41 = vld [vmem:[#allocation8 + $0x284] ss:$24 sps:$4 sm:$0xff]   ;;  %v1600_v0 = vmov 1966171168  }
  0x90   : > { %v1426_v40 = vld [vmem:[#allocation8 + $0x250] ss:$24 sps:$4 sm:$0xff]   ;;  %s225_s12 = smul.u32 6, %s224_s26  ;;  %vm1054_vm1 = vcmp.lt.s32.totalorder %v229_v14, 256  ;;  %p1237_p11 = scmp.ne.s32.totalorder %s1641_s25, 7 }
  0x91   : > { %864 = vmatpush1.bf16.msra.mxu0 %v1317_v27  ;;  %903 = vmatpush1.bf16.msra.mxu1 %v1368_v44  ;;  %v1393_v27 = vld [vmem:[#allocation8 + $0x130] ss:$24 sps:$4 sm:$0xff]  }
  0x92   : > { %865 = vmatprep.subr.bf16.mxu0 %v1318_v28  ;;  %904 = vmatprep.subr.bf16.mxu1 %v1372_v45  ;;  %v1401_v28 = vld [vmem:[#allocation8 + $0x164] ss:$24 sps:$4 sm:$0xff]   ;;  %v1432_v44 = vld [vmem:[#allocation8 + $0x2b0] ss:$24 sps:$4 sm:$0xff]   ;;  %s226_s22 = scalar_lea.vmem [#allocation5], %s225_s12 }
  0x93   : > { %v1437_v45 = vld [vmem:[#allocation8 + $0x2e4] ss:$24 sps:$4 sm:$0xff]  }
  0x95   : > { %866 = vmatpush1.bf16.msra.mxu0 %v1320_v33  ;;  %905 = vmatpush1.bf16.msra.mxu1 %v1374_v48  ;;  %v1413_v33 = vld [vmem:[#allocation8 + $0x1c4] ss:$24 sps:$4 sm:$0xff]  }
  0x96   : > { %867 = vmatprep.subr.bf16.mxu0 %v1321_v34  ;;  %906 = vmatprep.subr.bf16.mxu1 %v1378_v49  ;;  %v1411_v34 = vld [vmem:[#allocation8 + $0x1c0] ss:$24 sps:$4 sm:$0xff]  }
  0x99   : > { %868 = vmatpush1.bf16.msra.mxu0 %v1323_v38  ;;  %907 = vmatpush1.bf16.msra.mxu1 %v1380_v52  ;;  %v1423_v38 = vld [vmem:[#allocation8 + $0x220] ss:$24 sps:$4 sm:$0xff]  }
  0x9a   : > { %869 = vmatprep.subr.bf16.mxu0 %v1324_v39  ;;  %908 = vmatprep.subr.bf16.mxu1 %v1384_v53  ;;  %v1428_v39 = vld [vmem:[#allocation8 + $0x254] ss:$24 sps:$4 sm:$0xff]  }
  0x9d   : > { %870 = vmatpush1.bf16.msra.mxu0 %v1326_v42  ;;  %909 = vmatpush1.bf16.msra.mxu1 %v1386_v56  ;;  %v1429_v42 = vld [vmem:[#allocation8 + $0x280] ss:$24 sps:$4 sm:$0xff]  }
  0x9e   : > { %871 = vmatprep.subr.bf16.mxu0 %v1327_v43  ;;  %910 = vmatprep.subr.bf16.mxu1 %v1390_v57  ;;  %v1434_v43 = vld [vmem:[#allocation8 + $0x2b4] ss:$24 sps:$4 sm:$0xff]   ;;  %v829_v57 = vsub.s32 2, %v1752_v20 }
  0xa1   : > { %872 = vmatpush1.bf16.msra.mxu0 %v1329_v46  ;;  %911 = vmatpush1.bf16.msra.mxu1 %v1392_v61  ;;  %v1435_v46 = vld [vmem:[#allocation8 + $0x2e0] ss:$24 sps:$4 sm:$0xff]  }
  0xa2   : > { %873 = vmatprep.subr.bf16.mxu0 %v1333_v47  ;;  %912 = vmatprep.subr.bf16.mxu1 %v1396_v62  ;;  %v337_v47 = vld [vmem:[#allocation10] sm:$0x3f] }
  0xa3   : > { %v822_v48 = vrot.slane %v337_v47, %v231_v60  ;;  %v826_v49 = vrot.slane %v337_v47, %v235_v26 }
  0xa5   : > { %874 = vmatpush1.bf16.msra.mxu0 %v1335_v50  ;;  %913 = vmatpush1.bf16.msra.mxu1 %v1398_v2 }
  0xa6   : > { %875 = vmatprep.subr.bf16.mxu0 %v1339_v51  ;;  %914 = vmatprep.subr.bf16.mxu1 %v1402_v3 }
  0xa9   : > { %876 = vmatpush1.bf16.msra.mxu0 %v1341_v54  ;;  %915 = vmatpush1.bf16.msra.mxu1 %v1404_v6 }
  0xaa   : > { %877 = vmatprep.subr.bf16.mxu0 %v1345_v55  ;;  %916 = vmatprep.subr.bf16.mxu1 %v1408_v8 }
  0xad   : > { %878 = vmatpush1.bf16.msra.mxu0 %v1347_v58  ;;  %917 = vmatpush1.bf16.msra.mxu1 %v1410_v10  ;;  %v833_v58 = vsub.s32 3, %v1752_v20 }
  0xae   : > { %879 = vmatprep.subr.bf16.mxu0 %v1351_v59  ;;  %918 = vmatprep.subr.bf16.mxu1 %v1414_v12  ;;  %v830_v59 = vrot.slane %v337_v47, %v829_v57 }
  0xaf   : > { %v834_v61 = vrot.slane %v337_v47, %v833_v58 }
  0xb1   : > { %880 = vmatpush1.bf16.msra.mxu0 %v1353_v63  ;;  %919 = vmatpush1.bf16.msra.mxu1 %v1416_v15 }
  0xb2   : > { %931 = vmatprep.subr.bf16.mxu0 %v1359_v1  ;;  %920 = vmatprep.subr.bf16.mxu1 %v1420_v17  ;;  %v976_v1 = vunpack.c.l.s4 %v1600_v0 }
  0xb4   : > { %882 = vmatmul.mubr.bf16.vlgmr.msra.gmra.mrb[0].mxu0 %v1768_v4 }
  0xb5   : > { %932 = vmatpush1.bf16.msra.mxu0 %v1357_v5  ;;  %963 = vmatprep.mubr.bf16.mxu0 %v1760_v35  ;;  %v1419_v35 = vld [vmem:[#allocation8 + $0x1f4] ss:$24 sps:$4 sm:$0xff]   ;;  %v977_v5 = vunpack.c.0.s8 %v976_v1 }
  0xb6   : > { %933 = vmatprep.subr.bf16.mxu0 %v1365_v7  ;;  %921 = vmatpush1.bf16.msra.mxu1 %v1422_v19  ;;  %v837_v19 = vsub.s32 4, %v1752_v20 }
  0xb7   : > { %v980_v6 = vsub.s32 %v977_v5, %v1752_v20 }
  0xb9   : > { %934 = vmatpush1.bf16.msra.mxu0 %v1363_v9  ;;  %923 = vmatmul.mubr.bf16.vlgmr.msra.gmra.mrb[0].mxu1 %v1768_v4  ;;  %v227_v9 = vld [vmem:[%s226_s22] sm:$0x3f] }
  0xba   : > { %935 = vmatprep.subr.bf16.mxu0 %v1371_v11 }
  0xbd   : > { %936 = vmatpush1.bf16.msra.mxu0 %v1369_v13  ;;  %v998_v13 = vrot.slane %v227_v9, 2 }
  0xbe   : > { %937 = vmatprep.subr.bf16.mxu0 %v1377_v16 }
  0xc1   : > { %938 = vmatpush1.bf16.msra.mxu0 %v1375_v18 }
  0xc2   : > { %939 = vmatprep.subr.bf16.mxu0 %v1383_v21  ;;  %v841_v21 = vsub.s32 5, %v1752_v20 }
  0xc5   : > { %940 = vmatpush1.bf16.msra.mxu0 %v1381_v22 }
  0xc6   : > { %941 = vmatprep.subr.bf16.mxu0 %v1389_v23  ;;  %v838_v23 = vrot.slane %v337_v47, %v837_v19 }
  0xc9   : > { %942 = vmatpush1.bf16.msra.mxu0 %v1387_v24  ;;  %v842_v24 = vrot.slane %v337_v47, %v841_v21 }
  0xca   : > { %943 = vmatprep.subr.bf16.mxu0 %v1395_v25 }
  0xcd   : > { %944 = vmatpush1.bf16.msra.mxu0 %v1393_v27 }
  0xce   : > { %945 = vmatprep.subr.bf16.mxu0 %v1401_v28 }
  0xd1   : > { %946 = vmatpush1.bf16.msra.mxu0 %v1399_v29 }
  0xd2   : > { %947 = vmatprep.subr.bf16.mxu0 %v1407_v31 }
  0xd5   : > { %948 = vmatpush1.bf16.msra.mxu0 %v1405_v32 }
  0xd6   : > { %949 = vmatprep.subr.bf16.mxu0 %v1413_v33 }
  0xd9   : > { %950 = vmatpush1.bf16.msra.mxu0 %v1411_v34 }
  0xda   : > { %951 = vmatprep.subr.bf16.mxu0 %v1419_v35 }
  0xdd   : > { %952 = vmatpush1.bf16.msra.mxu0 %v1417_v36 }
  0xde   : > { %953 = vmatprep.subr.bf16.mxu0 %v1425_v37 }
  0xe1   : > { %954 = vmatpush1.bf16.msra.mxu0 %v1423_v38  ;;  %v1044_v38 = vrot.slane %v227_v9, 4 }
  0xe2   : > { %955 = vmatprep.subr.bf16.mxu0 %v1428_v39 }
  0xe5   : > { %956 = vmatpush1.bf16.msra.mxu0 %v1426_v40 }
  0xe6   : > { %957 = vmatprep.subr.bf16.mxu0 %v1431_v41 }
  0xe9   : > { %958 = vmatpush1.bf16.msra.mxu0 %v1429_v42 }
  0xea   : > { %959 = vmatprep.subr.bf16.mxu0 %v1434_v43 }
  0xed   : > { %960 = vmatpush1.bf16.msra.mxu0 %v1432_v44 }
  0xee   : > { %961 = vmatprep.subr.bf16.mxu0 %v1437_v45 }
  0xf1   : > { %962 = vmatpush1.bf16.msra.mxu0 %v1435_v46 }
  0xf4   : > { %964 = vmatmul.mubr.bf16.vlgmr.msra.gmra.mrb[4].mxu0 %v1768_v4 }
 0x187   : > { %v883_v50 = vpop.f32.mrb[0].mxu0 }
 0x188   : > { %v884_v51 = vadd.f32 %v883_v50, %v822_v48  ;;  %v885_v52 = vpop.f32.mrb[1].mxu0 }
 0x189   : > { %v886_v53 = vadd.f32 %v885_v52, %v826_v49  ;;  %v887_v54 = vpop.f32.mrb[2].mxu0 }
 0x18a   : > { %v888_v55 = vpop.f32.mrb[3].mxu0 }
 0x18b   : > { %v974_v56 = vcombine.low %v884_v51, %v886_v53 }
 0x18c   : > { %v924_v62 = vpop.f32.mrb[0].mxu1 }
 0x18d   : > { %v925_v63 = vadd.f32 %v924_v62, %v830_v59  ;;  %v926_v60 = vpop.f32.mrb[1].mxu1  ;;  %v981_v7 = vrot.slane %v974_v56, %v980_v6 }
 0x18e   : > { %v927_v26 = vadd.f32 %v926_v60, %v834_v61  ;;  %v928_v2 = vpop.f32.mrb[2].mxu1 }
 0x18f   : > { %v929_v3 = vpop.f32.mrb[3].mxu1  ;;  %v988_v8 = vrot.slane %v981_v7, %v980_v6 }
 0x190   : > { %v1002_v4 = vcombine.low %v925_v63, %v927_v26 }
 0x191   : > { %v990_v10 = vadd.f32 %v988_v8, %v227_v9 }
 0x192   : > { %v1009_v11 = vrot.slane %v1002_v4, %v980_v6 }
 0x193   : > { %v1235_v12 = vmul.f32 -1.442695, %v990_v10 }
 0x194   : > { %v1016_v15 = vrot.slane %v1009_v11, %v980_v6 }
 0x195   : > { %1438 = vpow2.f32 %v1235_v12 }
 0x196   : > { %v1018_v16 = vadd.f32 %v1016_v15, %v998_v13 }
 0x198   : > { %v1236_v17 = vmul.f32 -1.442695, %v1018_v16 }
 0x19a   : > { %1440 = vpow2.f32 %v1236_v17 }
 0x19f   : > { %v1439_v18 = vpop.eup %1438 }
 0x1a0   : > { %v994_v22 = vadd.f32 1.0, %v1439_v18 }
 0x1a2   : > { %1442 = vrcp.f32 %v994_v22 }
 0x1a4   : > { %v1441_v27 = vpop.eup %1440 }
 0x1a5   : > { %v1022_v34 = vadd.f32 1.0, %v1441_v27 }
 0x1a7   : > { %1444 = vrcp.f32 %v1022_v34 }
 0x1ac   : > { %v1443_v39 = vpop.eup %1442 }
 0x1b1   : > { %v1445_v41 = vpop.eup %1444 }
 0x1b2   : > { %v1048_v42 = vsub.f32 1.0, %v1445_v41  ;;  %v1050_v44 = vmul.f32 %v1445_v41, %v1755_v30 }
 0x1c7   : > { %v965_v25 = vpop.f32.mrb[4].mxu0 }
 0x1c8   : > { %v966_v28 = vadd.f32 %v965_v25, %v838_v23  ;;  %v967_v29 = vpop.f32.mrb[5].mxu0 }
 0x1c9   : > { %v968_v31 = vadd.f32 %v967_v29, %v842_v24  ;;  %v969_v32 = vpop.f32.mrb[6].mxu0 }
 0x1ca   : > { %v970_v33 = vpop.f32.mrb[7].mxu0 }
 0x1cb   : > { %v1027_v35 = vcombine.low %v966_v28, %v968_v31 }
 0x1cd   : > { %v1034_v36 = vrot.slane %v1027_v35, %v980_v6 }
 0x1cf   : > { %v1041_v37 = vrot.slane %v1034_v36, %v980_v6 }
 0x1d1   : > { %v1043_v40 = vmul.f32 %v1443_v39, %v1041_v37 }
 0x1d3   : > { %v1046_v20 = vadd.f32 %v1044_v38, %v1043_v40 }
 0x1d5   : > { %1446 = vtanh.f32 %v1046_v20 }
 0x1de   : > { %1060 = sbr.rel (%p1237_p11) target bundleno = 485 (0x1e5), region = 56 }
 0x1df   : > { %v1447_v43 = vpop.eup %1446 }
 0x1e0   : > { %v1049_v45 = vmul.f32 %v1447_v43, %v1048_v42 }
 0x1e2   : > { %v1051_v46 = vadd.f32 %v1050_v44, %v1049_v45 }
 0x1e4   : > { %1056 = vst.msk [vmem:[#allocation2] sm:$0x3] %vm1054_vm1, %v1051_v46  ;;  %1061 = vst.msk [vmem:[#allocation11] sm:$0x3] (!%p1237_p11), %vm1054_vm1, %v1051_v46 }
 0x1e5 PF: > { %p1274_p5 = scmp.eq.s32.totalorder %s1641_s25, 7  ;;  %s1601_s0 = smov [#allocation11]  }
 0x1e6   : > { %s1069_s27 = sshll.u32 %s1601_s0, 4  ;;  %s1070_s27 = int_to_ptr.vmem [resolvable:$true] %s1069_s27 }
 0x1e7   : > { %s1544_s30 = scalar_lea.vmem %s1070_s27, 32  ;;  %p1551_p0 = scmp.lt.s32.totalorder %s1070_s27, %s1070_s27 }
 0x1e8   : > { %p1545_p6 = scmp.ne.s32.totalorder %s1070_s27, %s1544_s30  ;;  %p1552_p7 = scmp.lt.s32.totalorder %s1544_s30, %s1544_s30 }
 0x1ea   : > { %p1546_p10 = pnand %p1545_p6, %p1274_p5  ;;  %p1553_p1 = por %p1552_p7, %p1551_p0 }
 0x1ec   : > { %p1547_p12 = pneg %p1546_p10 }
 0x1ee   : > { %p1554_p2 = pnand %p1553_p1, %p1547_p12 }
 0x1f0   : > { %1557 = shalt.err (!%p1554_p2)
}
 0x1f1   : > { %s1558_s8 = scalar_lea.hbm %s1818_s5, 32 }
 0x1f2   : > { %p1559_p3 = scmp.ne.s32.totalorder %s1818_s5, %s1558_s8  ;;  %p1564_p8 = scmp.lt.u32.totalorder %s1558_s8, %s1818_s5 }
 0x1f4   : > { %p1560_p13 = pnand %p1559_p3, %p1274_p5 }
 0x1f6   : > { %p1561_p4 = pneg %p1560_p13 }
 0x1f8   : > { %p1566_p9 = pnand %p1564_p8, %p1561_p4 }
 0x1fa   : > { %1569 = shalt.err (!%p1566_p9)
}
 0x1fb   : > { %1255 = dma.vmem_to_hbm [thread:$0]  (%p1274_p5), %s1070_s27, 32, %s1818_s5, [#allocation7]  }
 0x1fc   : > { %1585 = dma.done.wait (%p1274_p5), [#allocation7], 32  }
 0x1fd   : > { %1587 = vsyncadd (%p1274_p5), [#allocation7], 4294967264 }
 0x1fe PF: > { %s24_s23 = sadd.s32 1, %s1590_s23  }
 0x1ff   : > { %p21_p11 = scmp.ge.s32.totalorder %s24_s23, 10  }
 0x201   :  { %23 = sbr.rel (!%p21_p11) target bundleno = 18 (0x12), region = 82 }
 0x208   :  { %1082 = vsyncpa [#allocation6], 1 }
 0x209   :  { %1084 = vsyncpa [#allocation6 + $0x1], 1 }
 0x20a   :  { %1085 = vsyncpa [#allocation9], 1 }
 0x20b   :  { %1086 = vsyncpa [#allocation7], 1 }
 0x20c   :  { %1088 = vsyncpa [#allocation7 + $0x1], 1 }

</bundles_post_ra>
